<compile_context>
chip_gen: v5e
topology: v5e:2x2
jax: 0.10.0
libtpu: 0.0.40
codegen_flags: <defaults>
</compile_context>

<pallas_src>
import functools
import math

import numpy as np
import jax
import jax.numpy as jnp
from jax.experimental import pallas as pl
from jax.experimental.pallas import tpu as pltpu


def mine_kernel(x_ref, z_ref, zm_ref, w1x_ref, w1z_ref, b1_ref, w2_ref, b2_ref,
                o_ref, accj_ref, accm_ref, accs_ref, *, batch_total):
    """One batch tile of the MINE objective.

    x_ref:   (TB, DX) bf16      z_ref / zm_ref: (TB, DZ) bf16   (zm = z[perm] tile)
    w1x_ref: (DX, H) bf16       w1z_ref: (DZ, H) bf16
    b1_ref:  (1, H)  f32        w2_ref:  (1, H) f32             b2_ref: (1,1) f32 SMEM
    o_ref:   (1, 1)  f32 SMEM output (written on the last tile only)
    accj/accm/accs: (1,1) f32 VMEM scratch — sum of joint T, running max of marginal
                    T, running (rescaled) sum of exp(marginal T).
    """
    i = pl.program_id(0)

    @pl.when(i == 0)
    def _():
        accj_ref[...] = jnp.zeros_like(accj_ref)
        # Large negative finite sentinel (exp underflows to 0 on the first rescale).
        accm_ref[...] = jnp.full(accm_ref.shape, -1e30, accm_ref.dtype)
        accs_ref[...] = jnp.zeros_like(accs_ref)

    b1 = b1_ref[...]                      # (1, H) f32
    w2 = w2_ref[...]                      # (1, H) f32
    b2 = b2_ref[0, 0]                     # f32 scalar (SMEM)

    # Shared x-contribution, computed once per tile (bf16 MXU, f32 accumulate).
    hx = jnp.dot(x_ref[...], w1x_ref[...], preferred_element_type=jnp.float32)
    pre = hx + b1                         # (TB, H) f32, reused by both branches

    # ---- Joint term first (keeps the peak live set of (TB,H) temporaries small).
    h_joint = jnp.maximum(
        pre + jnp.dot(z_ref[...], w1z_ref[...], preferred_element_type=jnp.float32),
        0.0)
    # Sublane (row) reduction first, then a single lane reduction against w2.
    hj_rows = jnp.sum(h_joint, axis=0, keepdims=True)                    # (1, H)
    accj_ref[...] += jnp.sum(hj_rows * w2, axis=-1, keepdims=True)       # (1, 1)

    # ---- Marginal term: z already permuted by the wrapper (exact gather).
    h_marg = jnp.maximum(
        pre + jnp.dot(zm_ref[...], w1z_ref[...], preferred_element_type=jnp.float32),
        0.0)
    t_marg = jnp.sum(h_marg * w2, axis=-1, keepdims=True) + b2           # (TB, 1)

    # ---- Online (streaming, max-stabilised) logsumexp across batch tiles.
    m_old = accm_ref[...]                                                # (1, 1)
    m_new = jnp.maximum(m_old, jnp.max(t_marg, keepdims=True))
    accs_ref[...] = (accs_ref[...] * jnp.exp(m_old - m_new)
                     + jnp.sum(jnp.exp(t_marg - m_new), keepdims=True))
    accm_ref[...] = m_new

    @pl.when(i == pl.num_programs(0) - 1)
    def _():
        mean_joint = accj_ref[...] * jnp.float32(1.0 / batch_total) + b2
        log_sum_exp = accm_ref[...] + jnp.log(accs_ref[...])
        lower_bound = mean_joint - log_sum_exp + jnp.float32(math.log(batch_total))
        o_ref[0, 0] = -lower_bound[0, 0]


def mine_forward(x, z, perm, w1x, w1z, b1, w2, b2, *, tb=64):
    """MINE loss.  x:(B,DX) z:(B,DZ) f32, perm:(B,) int, weights f32."""
    batch, dx = x.shape
    dz = z.shape[1]
    hidden = w1x.shape[1]
    assert batch % tb == 0, "batch must be a multiple of the batch tile"
    nb = batch // tb

    # Marginal z: exact HBM gather in the wrapper (no MXU / VPU cost in-kernel).
    z_marg = z[perm]

    # bf16 MXU operands (f32 accumulation inside the kernel); also halves input DMA.
    xb = x.astype(jnp.bfloat16)
    zb = z.astype(jnp.bfloat16)
    zmb = z_marg.astype(jnp.bfloat16)
    w1xb = w1x.astype(jnp.bfloat16)
    w1zb = w1z.astype(jnp.bfloat16)

    b2_smem = jnp.asarray(b2, jnp.float32).reshape(1, 1)

    grid_spec = pltpu.PrefetchScalarGridSpec(
        num_scalar_prefetch=0,
        grid=(nb,),
        in_specs=[
            pl.BlockSpec((tb, dx), lambda i: (i, 0)),       # x tile
            pl.BlockSpec((tb, dz), lambda i: (i, 0)),       # z tile
            pl.BlockSpec((tb, dz), lambda i: (i, 0)),       # z[perm] tile
            pl.BlockSpec((dx, hidden), lambda i: (0, 0)),   # w1x (resident)
            pl.BlockSpec((dz, hidden), lambda i: (0, 0)),   # w1z (resident)
            pl.BlockSpec((1, hidden), lambda i: (0, 0)),    # b1  (resident)
            pl.BlockSpec((1, hidden), lambda i: (0, 0)),    # w2  (resident)
            pl.BlockSpec(memory_space=pltpu.MemorySpace.SMEM),  # b2 scalar
        ],
        out_specs=pl.BlockSpec(memory_space=pltpu.MemorySpace.SMEM),
        scratch_shapes=[pltpu.VMEM((1, 1), jnp.float32),    # sum of joint T
                        pltpu.VMEM((1, 1), jnp.float32),    # running max (marginal)
                        pltpu.VMEM((1, 1), jnp.float32)],   # running sum exp
    )

    out = pl.pallas_call(
        functools.partial(mine_kernel, batch_total=batch),
        out_shape=jax.ShapeDtypeStruct((1, 1), jnp.float32),
        grid_spec=grid_spec,
        compiler_params=pltpu.CompilerParams(
            # Carried online-LSE accumulator => reduction axis is serial.
            dimension_semantics=("arbitrary",)),
    )(xb, zb, zmb, w1xb, w1zb, b1, w2, b2_smem)
    return out[0, 0]


def mine_reference(x, z, perm, w1x, w1z, b1, w2, b2, matmul_dtype=jnp.float32):
    """Pure-JAX reference mirroring the PyTorch forward semantics.

    `matmul_dtype=bf16` applies the same operand quantisation as the kernel's MXU
    path (f32 accumulation), for a tight apples-to-apples comparison.
    """
    z_marg = z[perm]

    def t_net(a, b):
        h = jnp.maximum(
            jnp.dot(a.astype(matmul_dtype), w1x.astype(matmul_dtype),
                    preferred_element_type=jnp.float32)
            + jnp.dot(b.astype(matmul_dtype), w1z.astype(matmul_dtype),
                      preferred_element_type=jnp.float32)
            + b1, 0.0)
        return jnp.sum(h * w2, axis=-1, keepdims=True) + b2         # (B, 1)

    joint = t_net(x, z)
    marginal = t_net(x, z_marg)
    lower_bound = (jnp.mean(joint)
                   - jnp.log(jnp.sum(jnp.exp(marginal)))
                   + jnp.log(jnp.float32(marginal.shape[0])))
    return -lower_bound


if __name__ == "__main__":
    # Lane/sublane-aligned small shapes: batch=128 (two 64-row tiles), x/z feature
    # dims 64 (= full-array minor dims), hidden=128.
    B, DX, DZ, H = 128, 64, 64, 128

    key = jax.random.PRNGKey(0)
    kx, kz, kperm, kw1x, kw1z, kb1, kw2, kb2 = jax.random.split(key, 8)

    x = jax.random.normal(kx, (B, DX), dtype=jnp.float32)
    z = jax.random.normal(kz, (B, DZ), dtype=jnp.float32)

    # "Shuffle z" trick from the module (permutation drawn host-side, mirroring
    # self.rng.permutation).
    perm = jax.random.permutation(kperm, B)

    # Deterministic parameter init for the 2-layer statistics network.
    w1x = 0.05 * jax.random.normal(kw1x, (DX, H), dtype=jnp.float32)
    w1z = 0.05 * jax.random.normal(kw1z, (DZ, H), dtype=jnp.float32)
    b1 = 0.05 * jax.random.normal(kb1, (1, H), dtype=jnp.float32)
    w2 = 0.05 * jax.random.normal(kw2, (1, H), dtype=jnp.float32)
    b2 = 0.05 * jax.random.normal(kb2, (1, 1), dtype=jnp.float32)

    loss = mine_forward(x, z, perm, w1x, w1z, b1, w2, b2, tb=64)
    loss = jax.block_until_ready(loss)

    # Tight check against a reference using the same bf16 MXU quantisation.
    ref_bf16 = jax.block_until_ready(
        mine_reference(x, z, perm, w1x, w1z, b1, w2, b2, matmul_dtype=jnp.bfloat16))
    np.testing.assert_allclose(np.asarray(loss), np.asarray(ref_bf16),
                               rtol=5e-4, atol=5e-4)

    # Loose sanity check against the full-precision PyTorch-equivalent reference.
    ref_f32 = jax.block_until_ready(
        mine_reference(x, z, perm, w1x, w1z, b1, w2, b2, matmul_dtype=jnp.float32))
    np.testing.assert_allclose(np.asarray(loss), np.asarray(ref_f32),
                               rtol=3e-2, atol=3e-2)

    print("KERNEL_OK")
</pallas_src>

<mosaic_0001>
module attributes {stable_mosaic.version = 11 : i64} {
  func.func @mine_kernel(%arg0: i32, %arg1: memref<64x64xbf16, #tpu.memory_space<vmem>>, %arg2: memref<64x64xbf16, #tpu.memory_space<vmem>>, %arg3: memref<64x64xbf16, #tpu.memory_space<vmem>>, %arg4: memref<64x128xbf16, #tpu.memory_space<vmem>>, %arg5: memref<64x128xbf16, #tpu.memory_space<vmem>>, %arg6: memref<1x128xf32, #tpu.memory_space<vmem>>, %arg7: memref<1x128xf32, #tpu.memory_space<vmem>>, %arg8: memref<1x1xf32, #tpu.memory_space<smem>>, %arg9: memref<1x1xf32, #tpu.memory_space<smem>>, %arg10: memref<1x1xf32, #tpu.memory_space<vmem>>, %arg11: memref<1x1xf32, #tpu.memory_space<vmem>>, %arg12: memref<1x1xf32, #tpu.memory_space<vmem>>) attributes {dimension_semantics = [#tpu.dimension_semantics<arbitrary>], iteration_bounds = array<i64: 2>, scalar_prefetch = 0 : i64, scratch_operands = 3 : i64, tpu.core_type = #tpu.core_type<tc>, window_params = [{transform_indices = @transform_0, window_bounds = array<i64: 64, 64>}, {transform_indices = @transform_1, window_bounds = array<i64: 64, 64>}, {transform_indices = @transform_2, window_bounds = array<i64: 64, 64>}, {pipeline_mode = #tpu.pipeline_mode<synchronous>, transform_indices = @transform_3, window_bounds = array<i64: 64, 128>}, {pipeline_mode = #tpu.pipeline_mode<synchronous>, transform_indices = @transform_4, window_bounds = array<i64: 64, 128>}, {pipeline_mode = #tpu.pipeline_mode<synchronous>, transform_indices = @transform_5, window_bounds = array<i64: 1, 128>}, {pipeline_mode = #tpu.pipeline_mode<synchronous>, transform_indices = @transform_6, window_bounds = array<i64: 1, 128>}, {transform_indices = @transform_7, window_bounds = array<i64: 1, 1>}, {transform_indices = @transform_8, window_bounds = array<i64: 1, 1>}]} {
    %c0_i32 = arith.constant 0 : i32
    %0 = arith.cmpi eq, %arg0, %c0_i32 : i32
    %1 = arith.extui %0 : i1 to i32
    %c0_i32_0 = arith.constant 0 : i32
    %2 = arith.cmpi ne, %1, %c0_i32_0 : i32
    scf.if %2 {
      %cst_40 = arith.constant 0.000000e+00 : f32
      %62 = vector.broadcast %cst_40 : f32 to vector<1x1xf32>
      %c0_41 = arith.constant 0 : index
      %c0_42 = arith.constant 0 : index
      %63 = vector.load %arg10[%c0_41, %c0_42] : memref<1x1xf32, #tpu.memory_space<vmem>>, vector<1x1xf32>
      tpu.vector_store %arg10[%c0_41, %c0_42], %62 {strides = array<i32>} : memref<1x1xf32, #tpu.memory_space<vmem>>, vector<1x1xf32>,
      %cst_43 = arith.constant -1.000000e+30 : f32
      %64 = vector.broadcast %cst_43 : f32 to vector<1x1xf32>
      %c0_44 = arith.constant 0 : index
      %c0_45 = arith.constant 0 : index
      %65 = vector.load %arg11[%c0_44, %c0_45] : memref<1x1xf32, #tpu.memory_space<vmem>>, vector<1x1xf32>
      tpu.vector_store %arg11[%c0_44, %c0_45], %64 {strides = array<i32>} : memref<1x1xf32, #tpu.memory_space<vmem>>, vector<1x1xf32>,
      %cst_46 = arith.constant 0.000000e+00 : f32
      %66 = vector.broadcast %cst_46 : f32 to vector<1x1xf32>
      %c0_47 = arith.constant 0 : index
      %c0_48 = arith.constant 0 : index
      %67 = vector.load %arg12[%c0_47, %c0_48] : memref<1x1xf32, #tpu.memory_space<vmem>>, vector<1x1xf32>
      tpu.vector_store %arg12[%c0_47, %c0_48], %66 {strides = array<i32>} : memref<1x1xf32, #tpu.memory_space<vmem>>, vector<1x1xf32>,
    } else {
    }
    %c0 = arith.constant 0 : index
    %c0_1 = arith.constant 0 : index
    %3 = vector.load %arg6[%c0, %c0_1] : memref<1x128xf32, #tpu.memory_space<vmem>>, vector<1x128xf32>
    %c0_2 = arith.constant 0 : index
    %c0_3 = arith.constant 0 : index
    %4 = vector.load %arg7[%c0_2, %c0_3] : memref<1x128xf32, #tpu.memory_space<vmem>>, vector<1x128xf32>
    %c0_4 = arith.constant 0 : index
    %c0_5 = arith.constant 0 : index
    %5 = memref.load %arg8[%c0_4, %c0_5] : memref<1x1xf32, #tpu.memory_space<smem>>
    %c0_6 = arith.constant 0 : index
    %c0_7 = arith.constant 0 : index
    %6 = vector.load %arg1[%c0_6, %c0_7] : memref<64x64xbf16, #tpu.memory_space<vmem>>, vector<64x64xbf16>
    %c0_8 = arith.constant 0 : index
    %c0_9 = arith.constant 0 : index
    %7 = vector.load %arg4[%c0_8, %c0_9] : memref<64x128xbf16, #tpu.memory_space<vmem>>, vector<64x128xbf16>
    %cst = arith.constant dense<0.000000e+00> : vector<64x128xf32>
    %8 = tpu.matmul %6, %7, %cst {dimension_numbers = #tpu.dot_dimension_numbers<[1], [0], [0], [1], [0, 0, 1, 1], [], []>} : vector<64x64xbf16>, vector<64x128xbf16>, vector<64x128xf32> -> vector<64x128xf32>
    %9 = vector.broadcast %3 : vector<1x128xf32> to vector<64x128xf32>
    %10 = arith.addf %8, %9 : vector<64x128xf32>
    %c0_10 = arith.constant 0 : index
    %c0_11 = arith.constant 0 : index
    %11 = vector.load %arg2[%c0_10, %c0_11] : memref<64x64xbf16, #tpu.memory_space<vmem>>, vector<64x64xbf16>
    %c0_12 = arith.constant 0 : index
    %c0_13 = arith.constant 0 : index
    %12 = vector.load %arg5[%c0_12, %c0_13] : memref<64x128xbf16, #tpu.memory_space<vmem>>, vector<64x128xbf16>
    %cst_14 = arith.constant dense<0.000000e+00> : vector<64x128xf32>
    %13 = tpu.matmul %11, %12, %cst_14 {dimension_numbers = #tpu.dot_dimension_numbers<[1], [0], [0], [1], [0, 0, 1, 1], [], []>} : vector<64x64xbf16>, vector<64x128xbf16>, vector<64x128xf32> -> vector<64x128xf32>
    %14 = arith.addf %10, %13 : vector<64x128xf32>
    %cst_15 = arith.constant 0.000000e+00 : f32
    %15 = vector.broadcast %cst_15 : f32 to vector<64x128xf32>
    %16 = arith.maximumf %14, %15 : vector<64x128xf32>
    %cst_16 = arith.constant dense<0.000000e+00> : vector<128xf32>
    %17 = vector.multi_reduction <add>, %16, %cst_16 [0] : vector<64x128xf32> to vector<128xf32>
    %18 = vector.shape_cast %17 : vector<128xf32> to vector<1x128xf32>
    %c0_17 = arith.constant 0 : index
    %c0_18 = arith.constant 0 : index
    %19 = vector.load %arg10[%c0_17, %c0_18] : memref<1x1xf32, #tpu.memory_space<vmem>>, vector<1x1xf32>
    %20 = arith.mulf %18, %4 : vector<1x128xf32>
    %cst_19 = arith.constant dense<0.000000e+00> : vector<1xf32>
    %21 = vector.multi_reduction <add>, %20, %cst_19 [1] : vector<1x128xf32> to vector<1xf32>
    %22 = vector.shape_cast %21 : vector<1xf32> to vector<1x1xf32>
    %23 = arith.addf %19, %22 : vector<1x1xf32>
    %c0_20 = arith.constant 0 : index
    %c0_21 = arith.constant 0 : index
    %24 = vector.load %arg10[%c0_20, %c0_21] : memref<1x1xf32, #tpu.memory_space<vmem>>, vector<1x1xf32>
    tpu.vector_store %arg10[%c0_20, %c0_21], %23 {strides = array<i32>} : memref<1x1xf32, #tpu.memory_space<vmem>>, vector<1x1xf32>,
    %c0_22 = arith.constant 0 : index
    %c0_23 = arith.constant 0 : index
    %25 = vector.load %arg3[%c0_22, %c0_23] : memref<64x64xbf16, #tpu.memory_space<vmem>>, vector<64x64xbf16>
    %c0_24 = arith.constant 0 : index
    %c0_25 = arith.constant 0 : index
    %26 = vector.load %arg5[%c0_24, %c0_25] : memref<64x128xbf16, #tpu.memory_space<vmem>>, vector<64x128xbf16>
    %cst_26 = arith.constant dense<0.000000e+00> : vector<64x128xf32>
    %27 = tpu.matmul %25, %26, %cst_26 {dimension_numbers = #tpu.dot_dimension_numbers<[1], [0], [0], [1], [0, 0, 1, 1], [], []>} : vector<64x64xbf16>, vector<64x128xbf16>, vector<64x128xf32> -> vector<64x128xf32>
    %28 = arith.addf %10, %27 : vector<64x128xf32>
    %cst_27 = arith.constant 0.000000e+00 : f32
    %29 = vector.broadcast %cst_27 : f32 to vector<64x128xf32>
    %30 = arith.maximumf %28, %29 : vector<64x128xf32>
    %31 = vector.broadcast %4 : vector<1x128xf32> to vector<64x128xf32>
    %32 = arith.mulf %30, %31 : vector<64x128xf32>
    %cst_28 = arith.constant dense<0.000000e+00> : vector<64xf32>
    %33 = vector.multi_reduction <add>, %32, %cst_28 [1] : vector<64x128xf32> to vector<64xf32>
    %34 = vector.shape_cast %33 : vector<64xf32> to vector<64x1xf32>
    %35 = vector.broadcast %5 : f32 to vector<64x1xf32>
    %36 = arith.addf %34, %35 : vector<64x1xf32>
    %c0_29 = arith.constant 0 : index
    %c0_30 = arith.constant 0 : index
    %37 = vector.load %arg11[%c0_29, %c0_30] : memref<1x1xf32, #tpu.memory_space<vmem>>, vector<1x1xf32>
    %38 = vector.shape_cast %36 : vector<64x1xf32> to vector<1x64x1xf32>
    %cst_31 = arith.constant dense<0xFF800000> : vector<1xf32>
    %39 = vector.multi_reduction <maximumf>, %38, %cst_31 [1, 2] : vector<1x64x1xf32> to vector<1xf32>
    %40 = vector.shape_cast %39 : vector<1xf32> to vector<1x1x1xf32>
    %41 = vector.extract %40[0, 0, 0] : f32 from vector<1x1x1xf32>
    %42 = vector.broadcast %41 : f32 to vector<1x1xf32>
    %43 = arith.maximumf %37, %42 : vector<1x1xf32>
    %c0_32 = arith.constant 0 : index
    %c0_33 = arith.constant 0 : index
    %44 = vector.load %arg12[%c0_32, %c0_33] : memref<1x1xf32, #tpu.memory_space<vmem>>, vector<1x1xf32>
    %45 = arith.subf %37, %43 : vector<1x1xf32>
    %46 = math.exp %45 : vector<1x1xf32>
    %47 = arith.mulf %44, %46 : vector<1x1xf32>
    %48 = vector.broadcast %43 : vector<1x1xf32> to vector<64x1xf32>
    %49 = arith.subf %36, %48 : vector<64x1xf32>
    %50 = math.exp %49 : vector<64x1xf32>
    %51 = vector.shape_cast %50 : vector<64x1xf32> to vector<1x64x1xf32>
    %cst_34 = arith.constant dense<0.000000e+00> : vector<1xf32>
    %52 = vector.multi_reduction <add>, %51, %cst_34 [1, 2] : vector<1x64x1xf32> to vector<1xf32>
    %53 = vector.shape_cast %52 : vector<1xf32> to vector<1x1x1xf32>
    %54 = vector.extract %53[0, 0, 0] : f32 from vector<1x1x1xf32>
    %55 = vector.broadcast %54 : f32 to vector<1x1xf32>
    %56 = arith.addf %47, %55 : vector<1x1xf32>
    %c0_35 = arith.constant 0 : index
    %c0_36 = arith.constant 0 : index
    %57 = vector.load %arg12[%c0_35, %c0_36] : memref<1x1xf32, #tpu.memory_space<vmem>>, vector<1x1xf32>
    tpu.vector_store %arg12[%c0_35, %c0_36], %56 {strides = array<i32>} : memref<1x1xf32, #tpu.memory_space<vmem>>, vector<1x1xf32>,
    %c0_37 = arith.constant 0 : index
    %c0_38 = arith.constant 0 : index
    %58 = vector.load %arg11[%c0_37, %c0_38] : memref<1x1xf32, #tpu.memory_space<vmem>>, vector<1x1xf32>
    tpu.vector_store %arg11[%c0_37, %c0_38], %43 {strides = array<i32>} : memref<1x1xf32, #tpu.memory_space<vmem>>, vector<1x1xf32>,
    %c1_i32 = arith.constant 1 : i32
    %59 = arith.cmpi eq, %arg0, %c1_i32 : i32
    %60 = arith.extui %59 : i1 to i32
    %c0_i32_39 = arith.constant 0 : i32
    %61 = arith.cmpi ne, %60, %c0_i32_39 : i32
    scf.if %61 {
      %c0_40 = arith.constant 0 : index
      %c0_41 = arith.constant 0 : index
      %62 = vector.load %arg10[%c0_40, %c0_41] : memref<1x1xf32, #tpu.memory_space<vmem>>, vector<1x1xf32>
      %cst_42 = arith.constant 7.812500e-03 : f32
      %63 = vector.broadcast %cst_42 : f32 to vector<1x1xf32>
      %64 = arith.mulf %62, %63 : vector<1x1xf32>
      %65 = vector.broadcast %5 : f32 to vector<1x1xf32>
      %66 = arith.addf %64, %65 : vector<1x1xf32>
      %c0_43 = arith.constant 0 : index
      %c0_44 = arith.constant 0 : index
      %67 = vector.load %arg11[%c0_43, %c0_44] : memref<1x1xf32, #tpu.memory_space<vmem>>, vector<1x1xf32>
      %c0_45 = arith.constant 0 : index
      %c0_46 = arith.constant 0 : index
      %68 = vector.load %arg12[%c0_45, %c0_46] : memref<1x1xf32, #tpu.memory_space<vmem>>, vector<1x1xf32>
      %69 = math.log %68 : vector<1x1xf32>
      %70 = arith.addf %67, %69 : vector<1x1xf32>
      %71 = arith.subf %66, %70 : vector<1x1xf32>
      %cst_47 = arith.constant 4.85203028 : f32
      %72 = vector.broadcast %cst_47 : f32 to vector<1x1xf32>
      %73 = arith.addf %71, %72 : vector<1x1xf32>
      %74 = vector.extract %73[0, 0] : f32 from vector<1x1xf32>
      %cst_48 = arith.constant 0.000000e+00 : f32
      %75 = arith.subf %cst_48, %74 : f32
      %c0_49 = arith.constant 0 : index
      %c0_50 = arith.constant 0 : index
      %76 = memref.load %arg9[%c0_49, %c0_50] : memref<1x1xf32, #tpu.memory_space<smem>>
      memref.store %75, %arg9[%c0_49, %c0_50] : memref<1x1xf32, #tpu.memory_space<smem>>
    } else {
    }
    return
  }
  func.func @transform_0(%arg0: i32) -> (i32, i32) {
    %c0_i32 = arith.constant 0 : i32
    %c0_i32_0 = arith.constant 0 : i32
    return %arg0, %c0_i32 : i32, i32
  }
  func.func @transform_1(%arg0: i32) -> (i32, i32) {
    %c0_i32 = arith.constant 0 : i32
    %c0_i32_0 = arith.constant 0 : i32
    return %arg0, %c0_i32 : i32, i32
  }
  func.func @transform_2(%arg0: i32) -> (i32, i32) {
    %c0_i32 = arith.constant 0 : i32
    %c0_i32_0 = arith.constant 0 : i32
    return %arg0, %c0_i32 : i32, i32
  }
  func.func @transform_3(%arg0: i32) -> (i32, i32) {
    %c0_i32 = arith.constant 0 : i32
    %c0_i32_0 = arith.constant 0 : i32
    %c0_i32_1 = arith.constant 0 : i32
    return %c0_i32, %c0_i32_0 : i32, i32
  }
  func.func @transform_4(%arg0: i32) -> (i32, i32) {
    %c0_i32 = arith.constant 0 : i32
    %c0_i32_0 = arith.constant 0 : i32
    %c0_i32_1 = arith.constant 0 : i32
    return %c0_i32, %c0_i32_0 : i32, i32
  }
  func.func @transform_5(%arg0: i32) -> (i32, i32) {
    %c0_i32 = arith.constant 0 : i32
    %c0_i32_0 = arith.constant 0 : i32
    %c0_i32_1 = arith.constant 0 : i32
    return %c0_i32, %c0_i32_0 : i32, i32
  }
  func.func @transform_6(%arg0: i32) -> (i32, i32) {
    %c0_i32 = arith.constant 0 : i32
    %c0_i32_0 = arith.constant 0 : i32
    %c0_i32_1 = arith.constant 0 : i32
    return %c0_i32, %c0_i32_0 : i32, i32
  }
  func.func @transform_7(%arg0: i32) -> (i32, i32) {
    %c0_i32 = arith.constant 0 : i32
    %c0_i32_0 = arith.constant 0 : i32
    %c0_i32_1 = arith.constant 0 : i32
    return %c0_i32, %c0_i32_0 : i32, i32
  }
  func.func @transform_8(%arg0: i32) -> (i32, i32) {
    %c0_i32 = arith.constant 0 : i32
    %c0_i32_0 = arith.constant 0 : i32
    %c0_i32_1 = arith.constant 0 : i32
    return %c0_i32, %c0_i32_0 : i32, i32
  }
}

</mosaic_0001>

<bundles_post_ra>
// kernel: tpu_custom_call.1
= control target key start
LH: loop header
LB: loop body
LE: loop exit
PB: predicated region body
PF: predicated region fallthrough
CT: control target
= control target key end

     0   :  { %s1347_s0 = inlined_call_operand.vmem [shape: bf16[128,64], index: 0, kind: input, shape index: {}]   ;;  %s1348_s1 = inlined_call_operand.vmem [shape: bf16[128,64], index: 1, kind: input, shape index: {}]   ;;  %s1349_s2 = inlined_call_operand.vmem [shape: bf16[128,64], index: 2, kind: input, shape index: {}]   ;;  %s1350_s3 = inlined_call_operand.vmem [shape: bf16[64,128], index: 3, kind: input, shape index: {}]   ;;  %s1351_s4 = inlined_call_operand.vmem [shape: bf16[64,128], index: 4, kind: input, shape index: {}]   ;;  %s1352_s5 = inlined_call_operand.vmem [shape: f32[1,128], index: 5, kind: input, shape index: {}]   ;;  %s1353_s6 = inlined_call_operand.vmem [shape: f32[1,128], index: 6, kind: input, shape index: {}]   ;;  %s1354_s7 = inlined_call_operand.<no memory space> [shape: f32[1,1], index: 7, kind: input, shape index: {}]   ;;  %s1355_s8 = inlined_call_operand.hbm [shape: f32[1,1], index: 8, kind: output, shape index: {}]  }
   0x1   :  { %13 = sst [smem:[#allocation5]] %s1354_s7 }
   0x2   :  { %14 = vsyncpa [#allocation7], 0  ;;  %s1197_s29 = smov 0  }
   0x3 LB: > { %s1203_s30 = sadd.s32 4294967295, %s1144_s29   ;;  %p918_p0 = scmp.ge.s32.totalorder %s1144_s29, 1  ;;  %s1144_s29 = sphi %s1197_s29, %s20_s29  }
   0x4   : > { %p282_p1 = scmp.lt.s32.totalorder %s1144_s29, 3 }
   0x6   : > { %p283_p2 = pnand %p918_p0, %p282_p1 }
   0x7   : > { %s919_s9 = sshll.u32 (!%p283_p2), %s1203_s30, 3  ;;  %p925_p4 = scmp.ne.s32.totalorder (!%p283_p2), %s1203_s30, 0 }
   0x8   : > { %286 = sbr.rel (%p283_p2) target bundleno = 699 (0x2bb), region = 52  ;;  %p322_p3 = scmp.lt.s32.totalorder (!%p283_p2), %s919_s9, 15 }
   0xd   : > { %s1357_s9 = smov (!%p322_p3, %s919_s9), 15  ;;  %343 = sbr.rel (%p925_p4) target bundleno = 22 (0x16), region = 56 }
   0xe   : > { %s920_s7 = sshll.u32 %s1357_s9, 2 }
   0xf   : > { %s1211_s12 = scalar_lea.vmem %s1347_s0, %s920_s7  ;;  %s1216_s15 = scalar_lea.vmem %s1348_s1, %s920_s7 }
  0x10   : > { %s1221_s18 = scalar_lea.vmem %s1349_s2, %s920_s7 }
  0x12   : > { %vm344_vm0 = vcmask 0   ;;  %v1146_v0 = vmov 0.0   ;;  %v1147_v1 = vmov -1e+30  }
  0x13   : > { %345 = vst.msk [vmem:[#allocation2] sm:$0x1] %vm344_vm0, %v1146_v0 }
  0x14   : > { %347 = vst.msk [vmem:[#allocation4] sm:$0x1] %vm344_vm0, %v1146_v0 }
  0x15   : > { %346 = vst.msk [vmem:[#allocation3] sm:$0x1] %vm344_vm0, %v1147_v1 }
  0x16 PF: > { %v1046_v2 = vld [vmem:[%s1350_s3 + $0x18] sm:$0xff]  ;;  %v1045_v5 = vld [vmem:[%s1350_s3 + $0x10] sm:$0xff]  ;;  %v1044_v8 = vld [vmem:[%s1350_s3 + $0x8] sm:$0xff]  ;;  %vm414_vm1 = vcmask 523264   ;;  %vm588_vm2 = vcmask 1040384   ;;  %s350_s28 = sld [smem:[#allocation5]] }
  0x17   : > { %v1062_v3 = vld [vmem:[%s1351_s4 + $0x18] sm:$0xff]  ;;  %431 = vmatpush.bf16.msra.mxu0 %v1046_v2  ;;  %1063 = vmatpush.bf16.msra.mxu3 %v1046_v2  ;;  %v1061_v6 = vld [vmem:[%s1351_s4 + $0x10] sm:$0xff]  ;;  %v1060_v9 = vld [vmem:[%s1351_s4 + $0x8] sm:$0xff]  ;;  %vm593_vm3 = vcmask 0   ;;  %vm797_vm4 = vcmask 7168   ;;  %p1034_p5 = scmp.ne.s32.totalorder %s1203_s30, 1 }
  0x18   : > { %v1054_v4 = vld [vmem:[%s1351_s4 + $0x18] sm:$0xff]  ;;  %1071 = vmatpush.bf16.msra.mxu2 %v1062_v3  ;;  %v1053_v7 = vld [vmem:[%s1351_s4 + $0x10] sm:$0xff]  ;;  %v1052_v10 = vld [vmem:[%s1351_s4 + $0x8] sm:$0xff] }
  0x19   : > { %1067 = vmatpush.bf16.msra.mxu1 %v1054_v4  ;;  %v1043_v11 = vld [vmem:[%s1350_s3] sm:$0xff]  ;;  %v1040_v15 = vld [vmem:[%s1211_s12 + $0x8] sm:$0xff]  ;;  %v1041_v18 = vld [vmem:[%s1211_s12 + $0x10] sm:$0xff] }
  0x1a   : > { %v1059_v12 = vld [vmem:[%s1351_s4] sm:$0xff]  ;;  %v1056_v16 = vld [vmem:[%s1221_s18 + $0x8] sm:$0xff]  ;;  %v1057_v20 = vld [vmem:[%s1221_s18 + $0x10] sm:$0xff] }
  0x1b   : > { %432 = vmatpush.bf16.msra.mxu0 %v1045_v5  ;;  %1064 = vmatpush.bf16.msra.mxu3 %v1045_v5  ;;  %v1051_v13 = vld [vmem:[%s1351_s4] sm:$0xff]  ;;  %v1048_v17 = vld [vmem:[%s1216_s15 + $0x8] sm:$0xff]  ;;  %v1049_v21 = vld [vmem:[%s1216_s15 + $0x10] sm:$0xff] }
  0x1c   : > { %1072 = vmatpush.bf16.msra.mxu2 %v1061_v6  ;;  %v1039_v14 = vld [vmem:[%s1211_s12] sm:$0xff]  ;;  %v1042_v22 = vld [vmem:[%s1211_s12 + $0x18] sm:$0xff] }
  0x1d   : > { %1068 = vmatpush.bf16.msra.mxu1 %v1053_v7  ;;  %v1047_v19 = vld [vmem:[%s1216_s15] sm:$0xff]  ;;  %v1058_v24 = vld [vmem:[%s1221_s18 + $0x18] sm:$0xff] }
  0x1e   : > { %v1055_v23 = vld [vmem:[%s1221_s18] sm:$0xff]  ;;  %v1050_v25 = vld [vmem:[%s1216_s15 + $0x18] sm:$0xff] }
  0x1f   : > { %433 = vmatpush.bf16.msra.mxu0 %v1044_v8  ;;  %1065 = vmatpush.bf16.msra.mxu3 %v1044_v8  ;;  %v1287_v28 = vld [vmem:[%s1352_s5] ss:$0 sm:$0xff] }
  0x20   : > { %1073 = vmatpush.bf16.msra.mxu2 %v1060_v9  ;;  %v1293_v34 = vld [vmem:[%s1353_s6] ss:$0 sm:$0xff] }
  0x21   : > { %1069 = vmatpush.bf16.msra.mxu1 %v1052_v10 }
  0x23   : > { %434 = vmatpush.bf16.msra.mxu0 %v1043_v11  ;;  %1066 = vmatpush.bf16.msra.mxu3 %v1043_v11 }
  0x24   : > { %1074 = vmatpush.bf16.msra.mxu2 %v1059_v12 }
  0x25   : > { %1070 = vmatpush.bf16.msra.mxu1 %v1051_v13 }
  0x26   : > { %958 = vmatmul.msk.bf16.vlgmr.msra.gmra.mxu0 %vm414_vm1, %v1039_v14  ;;  %959 = vmatmul.msk.bf16.vlgmr.msra.gmra.mxu3 %vm414_vm1, %v1040_v15 }
  0x27   : > { %532 = vmatpush.bf16.msrb.mxu0 %v1054_v4  ;;  %1031 = vmatmul.msk.bf16.vlgmr.msra.gmra.mxu2 %vm414_vm1, %v1056_v16 }
  0x28   : > { %995 = vmatmul.msk.bf16.vlgmr.msra.gmra.mxu1 %vm414_vm1, %v1048_v17 }
  0x2b   : > { %533 = vmatpush.bf16.msrb.mxu0 %v1053_v7 }
  0x2f   : > { %534 = vmatpush.bf16.msrb.mxu0 %v1052_v10 }
  0x33   : > { %535 = vmatpush.bf16.msrb.mxu0 %v1051_v13 }
  0x36   : > { %960 = vmatmul.msk.bf16.gmra.mxu3 %vm414_vm1, %v1041_v18  ;;  %994 = vmatmul.msk.bf16.vlgmr.msrb.gmra.mxu0 %vm414_vm1, %v1047_v19 }
  0x37   : > { %671 = vmatpush.bf16.msra.mxu0 %v1062_v3  ;;  %1032 = vmatmul.msk.bf16.gmra.mxu2 %vm414_vm1, %v1057_v20 }
  0x38   : > { %996 = vmatmul.msk.bf16.gmra.mxu1 %vm414_vm1, %v1049_v21 }
  0x3b   : > { %672 = vmatpush.bf16.msra.mxu0 %v1061_v6 }
  0x3f   : > { %673 = vmatpush.bf16.msra.mxu0 %v1060_v9 }
  0x43   : > { %674 = vmatpush.bf16.msra.mxu0 %v1059_v12 }
  0x46   : > { %961 = vmatmul.msk.bf16.gmra.mxu3 %vm414_vm1, %v1042_v22  ;;  %1030 = vmatmul.msk.bf16.vlgmr.msra.gmra.mxu0 %vm414_vm1, %v1055_v23 }
  0x47   : > { %1033 = vmatmul.msk.bf16.gmra.mxu2 %vm414_vm1, %v1058_v24 }
  0x48   : > { %997 = vmatmul.msk.bf16.gmra.mxu1 %vm414_vm1, %v1050_v25 }
  0xa3   : > { %v436_v26 = vpop.f32.mrf.mxu0 }
  0xa4   : > { %v437_v51 = vadd.f32 %v1287_v28, %v436_v26 }
  0xa5   : > { %v542_v27 = vpop.f32.mrf.mxu1 }
  0xa9   : > { %v441_v29 = vpop.f32.mrf.mxu3 }
  0xaa   : > { %v442_v30 = vadd.f32 %v1287_v28, %v441_v29  ;;  %v681_v31 = vpop.f32.mrf.mxu2 }
  0xab   : > { %v438_v32 = vpop.f32.mrf.mxu0 }
  0xac   : > { %v698_v33 = vadd.f32 %v681_v31, %v442_v30  ;;  %v439_v47 = vadd.f32 %v1287_v28, %v438_v32  ;;  %v559_v60 = vadd.f32 %v542_v27, %v442_v30 }
  0xad   : > { %v544_v35 = vpop.f32.mrf.mxu1 }
  0xae   : > { %v706_v36 = vmax.f32 %v698_v33, 0.0  ;;  %v567_v4 = vmax.f32 %v559_v60, 0.0 }
  0xb0   : > { %v717_v37 = vmul.f32 %v1293_v34, %v706_v36 }
  0xb1   : > { %v443_v38 = vpop.f32.mrf.mxu3 }
  0xb2   : > { %v444_v39 = vadd.f32 %v1287_v28, %v443_v38  ;;  %v683_v40 = vpop.f32.mrf.mxu2  ;;  %727 = vadd.xlane.f32.xlu1 %v717_v37 }
  0xb3   : > { %v537_v41 = vpop.f32.mrf.mxu0 }
  0xb4   : > { %v699_v42 = vadd.f32 %v683_v40, %v444_v39  ;;  %v557_v55 = vadd.f32 %v537_v41, %v437_v51  ;;  %v560_v5 = vadd.f32 %v544_v35, %v444_v39 }
  0xb5   : > { %v547_v43 = vpop.f32.mrf.mxu1 }
  0xb6   : > { %v707_v44 = vmax.f32 %v699_v42, 0.0  ;;  %v565_v61 = vmax.f32 %v557_v55, 0.0  ;;  %v568_v13 = vmax.f32 %v560_v5, 0.0 }
  0xb8   : > { %v718_v45 = vmul.f32 %v1293_v34, %v707_v44 }
  0xb9   : > { %v446_v46 = vpop.f32.mrf.mxu3 }
  0xba   : > { %v447_v48 = vadd.f32 %v1287_v28, %v446_v46  ;;  %v686_v49 = vpop.f32.mrf.mxu2  ;;  %729 = vadd.xlane.f32.xlu1 %v718_v45 }
  0xbb   : > { %v539_v50 = vpop.f32.mrf.mxu0 }
  0xbc   : > { %v700_v52 = vadd.f32 %v686_v49, %v447_v48  ;;  %v558_v53 = vadd.f32 %v539_v50, %v439_v47  ;;  %v561_v14 = vadd.f32 %v547_v43, %v447_v48  ;;  %v349_v49 = vld [vmem:[%s1353_s6] sm:$0x1] }
  0xbd   : > { %v549_v54 = vpop.f32.mrf.mxu1 }
  0xbe   : > { %v708_v56 = vmax.f32 %v700_v52, 0.0  ;;  %v566_v57 = vmax.f32 %v558_v53, 0.0  ;;  %v569_v21 = vmax.f32 %v561_v14, 0.0  ;;  %v586_v14 = vld [vmem:[#allocation2] sm:$0x1] }
  0xc0   : > { %v719_v58 = vmul.f32 %v1293_v34, %v708_v56  ;;  %v573_v1 = vadd.f32 %v566_v57, %v565_v61  ;;  %v1313_v57 = vstv %s350_s28 }
  0xc1   : > { %v448_v59 = vpop.f32.mrf.mxu3 }
  0xc2   : > { %v449_v62 = vadd.f32 %v1287_v28, %v448_v59  ;;  %v688_v63 = vpop.f32.mrf.mxu2  ;;  %731 = vadd.xlane.f32.xlu2 %v719_v58  ;;  %v574_v9 = vadd.f32 %v573_v1, %v567_v4 }
  0xc3   : > { %v676_v0 = vpop.f32.mrf.mxu0 }
  0xc4   : > { %v701_v2 = vadd.f32 %v688_v63, %v449_v62  ;;  %v696_v3 = vadd.f32 %v676_v0, %v437_v51  ;;  %v575_v18 = vadd.f32 %v574_v9, %v568_v13  ;;  %v562_v19 = vadd.f32 %v549_v54, %v449_v62 }
  0xc5   : > { %v552_v8 = vpop.f32.mrf.mxu1 }
  0xc6   : > { %v709_v6 = vmax.f32 %v701_v2, 0.0  ;;  %v704_v7 = vmax.f32 %v696_v3, 0.0  ;;  %v576_v24 = vadd.f32 %v575_v18, %v569_v21  ;;  %v570_v25 = vmax.f32 %v562_v19, 0.0  ;;  %v1324_v21 = vld [vmem:[#allocation3] sm:$0x1] }
  0xc8   : > { %v720_v10 = vmul.f32 %v1293_v34, %v709_v6  ;;  %v715_v11 = vmul.f32 %v1293_v34, %v704_v7  ;;  %v577_v35 = vadd.f32 %v576_v24, %v570_v25 }
  0xc9   : > { %v451_v12 = vpop.f32.mrf.mxu3 }
  0xca   : > { %v452_v15 = vadd.f32 %v1287_v28, %v451_v12  ;;  %v691_v16 = vpop.f32.mrf.mxu2  ;;  %733 = vadd.xlane.f32.xlu2 %v720_v10  ;;  %723 = vadd.xlane.f32.xlu0 %v715_v11 }
  0xcb   : > { %v678_v17 = vpop.f32.mrf.mxu0 }
  0xcc   : > { %v697_v20 = vadd.f32 %v678_v17, %v439_v47  ;;  %v563_v22 = vadd.f32 %v552_v8, %v452_v15  ;;  %v702_v26 = vadd.f32 %v691_v16, %v452_v15 }
  0xcd   : > { %v554_v30 = vpop.f32.mrf.mxu1 }
  0xce   : > { %v705_v23 = vmax.f32 %v697_v20, 0.0  ;;  %v571_v31 = vmax.f32 %v563_v22, 0.0  ;;  %v710_v36 = vmax.f32 %v702_v26, 0.0 }
  0xd0   : > { %v716_v27 = vmul.f32 %v1293_v34, %v705_v23  ;;  %v578_v39 = vadd.f32 %v577_v35, %v571_v31  ;;  %v721_v44 = vmul.f32 %v1293_v34, %v710_v36 }
  0xd1   : > { %v453_v29 = vpop.f32.mrf.mxu3 }
  0xd2   : > { %v454_v32 = vadd.f32 %v1287_v28, %v453_v29  ;;  %725 = vadd.xlane.f32.xlu0 %v716_v27  ;;  %v693_v33 = vpop.f32.mrf.mxu2 }
  0xd4   : > { %v703_v37 = vadd.f32 %v693_v33, %v454_v32  ;;  %v564_v38 = vadd.f32 %v554_v30, %v454_v32 }
  0xd6   : > { %v711_v40 = vmax.f32 %v703_v37, 0.0  ;;  %v572_v41 = vmax.f32 %v564_v38, 0.0 }
  0xd8   : > { %v579_v42 = vadd.f32 %v578_v39, %v572_v41  ;;  %v722_v43 = vmul.f32 %v1293_v34, %v711_v40 }
  0xda   : > { %v580_v45 = vrot.slane %v579_v42, 4  ;;  %737 = vadd.xlane.f32.xlu1 %v722_v43  ;;  %735 = vadd.xlane.f32.xlu0 %v721_v44 }
  0xdc   : > { %v581_v46 = vadd.f32 %v580_v45, %v579_v42 }
  0xde   : > { %v582_v47 = vrot.slane %v581_v46, 2 }
  0xe0   : > { %v583_v28 = vadd.f32 %v582_v47, %v581_v46 }
  0xe2   : > { %v584_v48 = vrot.slane %v583_v28, 1 }
  0xe4   : > { %v585_v50 = vadd.f32 %v584_v48, %v583_v28 }
  0xe6   : > { %v587_v51 = vmul.f32 %v585_v50, %v349_v49 }
  0xe8   : > { %v589_v52 = vsel %vm588_vm2, %v587_v51, 0.0 }
  0xe9   : > { %590 = vadd.xlane.f32.xlu0 %v589_v52 }
 0x125   : > { %v728_v53 = vpop.xlane.xlu1 %727 }
 0x126   : > { %v742_v62 = vadd.f32 %v1313_v57, %v728_v53 }
 0x12d   : > { %v730_v34 = vpop.xlane.xlu1 %729 }
 0x12e   : > { %v743_v63 = vadd.f32 %v1313_v57, %v730_v34 }
 0x135   : > { %v732_v55 = vpop.xlane.xlu2 %731 }
 0x136   : > { %v744_v2 = vadd.f32 %v1313_v57, %v732_v55 }
 0x13d   : > { %v724_v54 = vpop.xlane.xlu0 %723  ;;  %v734_v58 = vpop.xlane.xlu2 %733 }
 0x13e   : > { %v745_v60 = vadd.f32 %v1313_v57, %v734_v58  ;;  %v740_v61 = vadd.f32 %v1313_v57, %v724_v54 }
 0x140   : > { %v749_v6 = vmax.f32 %v740_v61, %v744_v2 }
 0x145   : > { %v726_v56 = vpop.xlane.xlu0 %725 }
 0x146   : > { %v741_v59 = vadd.f32 %v1313_v57, %v726_v56 }
 0x148   : > { %v750_v3 = vmax.f32 %v741_v59, %v745_v60 }
 0x14a   : > { %v753_v9 = vmax.f32 %v749_v6, %v750_v3 }
 0x14d   : > { %v738_v0 = vpop.xlane.xlu1 %737  ;;  %v736_v1 = vpop.xlane.xlu0 %735 }
 0x14e   : > { %v747_v4 = vadd.f32 %v1313_v57, %v738_v0  ;;  %v746_v5 = vadd.f32 %v1313_v57, %v736_v1 }
 0x150   : > { %v752_v7 = vmax.f32 %v743_v63, %v747_v4  ;;  %v751_v8 = vmax.f32 %v742_v62, %v746_v5 }
 0x152   : > { %v754_v10 = vmax.f32 %v751_v8, %v752_v7 }
 0x154   : > { %v755_v11 = vmax.f32 %v753_v9, %v754_v10 }
 0x156   : > { %v756_v12 = vrot.slane %v755_v11, 4 }
 0x158   : > { %v757_v13 = vmax.f32 %v755_v11, %v756_v12  ;;  %v765_v11 = vld [vmem:[#allocation4] sm:$0x1] }
 0x15a   : > { %v758_v15 = vrot.slane %v757_v13, 2 }
 0x15c   : > { %v591_v16 = vpop.xlane.xlu0 %590  ;;  %v759_v17 = vmax.f32 %v757_v13, %v758_v15 }
 0x15d   : > { %v592_v18 = vadd.f32 %v591_v16, %v586_v14 }
 0x15e   : > { %v760_v19 = vrot.slane %v759_v17, 1 }
 0x15f   : > { %594 = vst.msk [vmem:[#allocation2] sm:$0x1] %vm593_vm3, %v592_v18 }
 0x160   : > { %v761_v20 = vmax.f32 %v759_v17, %v760_v19 }
 0x162   : > { %1075 = vpush %v761_v20 }
 0x193   : > { %s1076_s9 = spop %1075 }
 0x194   : > { %v763_v22 = vstv %s1076_s9 }
 0x195   : > { %v764_v23 = vmax.f32 %v1324_v21, %v763_v22 }
 0x197   : > { %v766_v24 = vsub.f32 %v1324_v21, %v764_v23  ;;  %v771_v25 = vperm.slane %v764_v23, 0  ;;  %825 = vst.msk [vmem:[#allocation3] sm:$0x1] %vm593_vm3, %v764_v23 }
 0x199   : > { %v773_v26 = vsub.f32 %v740_v61, %v771_v25  ;;  %v774_v27 = vsub.f32 %v741_v59, %v771_v25  ;;  %v775_v29 = vsub.f32 %v742_v62, %v771_v25  ;;  %v776_v30 = vsub.f32 %v743_v63, %v771_v25 }
 0x19a   : > { %v777_v31 = vsub.f32 %v744_v2, %v771_v25  ;;  %v778_v35 = vsub.f32 %v745_v60, %v771_v25  ;;  %v779_v38 = vsub.f32 %v746_v5, %v771_v25  ;;  %v780_v40 = vsub.f32 %v747_v4, %v771_v25 }
 0x19b   : > { %v781_v32 = vmul.f32 1.442695, %v773_v26  ;;  %v783_v33 = vmul.f32 1.442695, %v774_v27  ;;  %v785_v36 = vmul.f32 1.442695, %v775_v29 }
 0x19c   : > { %v787_v37 = vmul.f32 1.442695, %v776_v30  ;;  %v789_v39 = vmul.f32 1.442695, %v777_v31  ;;  %v791_v41 = vmul.f32 1.442695, %v778_v35 }
 0x19d   : > { %1100 = vpow2.f32 %v781_v32  ;;  %v793_v42 = vmul.f32 1.442695, %v779_v38  ;;  %v795_v45 = vmul.f32 1.442695, %v780_v40  ;;  %v767_v9 = vmul.f32 1.442695, %v766_v24 }
 0x19e   : > { %1102 = vpow2.f32 %v783_v33 }
 0x19f   : > { %1104 = vpow2.f32 %v785_v36 }
 0x1a0   : > { %1106 = vpow2.f32 %v787_v37 }
 0x1a1   : > { %1108 = vpow2.f32 %v789_v39 }
 0x1a2   : > { %1110 = vpow2.f32 %v791_v41 }
 0x1a3   : > { %v1101_v43 = vpop.eup %1100  ;;  %1112 = vpow2.f32 %v793_v42 }
 0x1a4   : > { %v1103_v44 = vpop.eup %1102  ;;  %v798_v46 = vsel %vm797_vm4, %v1101_v43, 0.0  ;;  %1114 = vpow2.f32 %v795_v45 }
 0x1a5   : > { %v1105_v47 = vpop.eup %1104  ;;  %v799_v28 = vsel %vm797_vm4, %v1103_v44, 0.0  ;;  %1116 = vpow2.f32 %v767_v9 }
 0x1a6   : > { %v1107_v48 = vpop.eup %1106  ;;  %v800_v49 = vadd.f32 %v799_v28, %v798_v46  ;;  %v801_v50 = vsel %vm797_vm4, %v1105_v47, 0.0 }
 0x1a7   : > { %v1109_v51 = vpop.eup %1108  ;;  %v803_v53 = vsel %vm797_vm4, %v1107_v48, 0.0 }
 0x1a8   : > { %v802_v52 = vadd.f32 %v801_v50, %v800_v49  ;;  %v1111_v54 = vpop.eup %1110  ;;  %v805_v34 = vsel %vm797_vm4, %v1109_v51, 0.0 }
 0x1a9   : > { %v1113_v56 = vpop.eup %1112  ;;  %v807_v59 = vsel %vm797_vm4, %v1111_v54, 0.0 }
 0x1aa   : > { %v804_v55 = vadd.f32 %v803_v53, %v802_v52  ;;  %v1115_v60 = vpop.eup %1114  ;;  %v809_v62 = vsel %vm797_vm4, %v1113_v56, 0.0 }
 0x1ab   : > { %v811_v0 = vsel %vm797_vm4, %v1115_v60, 0.0  ;;  %v1117_v10 = vpop.eup %1116 }
 0x1ac   : > { %v806_v58 = vadd.f32 %v805_v34, %v804_v55  ;;  %v769_v12 = vmul.f32 %v1117_v10, %v765_v11 }
 0x1ae   : > { %v808_v61 = vadd.f32 %v807_v59, %v806_v58 }
 0x1b0   : > { %v810_v63 = vadd.f32 %v809_v62, %v808_v61 }
 0x1b2   : > { %v812_v1 = vadd.f32 %v811_v0, %v810_v63 }
 0x1b4   : > { %813 = vadd.xlane.f32.xlu2 %v812_v1 }
 0x227   : > { %v814_v2 = vpop.xlane.xlu2 %813 }
 0x228   : > { %v815_v3 = vrot.slane %v814_v2, 4 }
 0x22a   : > { %v816_v4 = vadd.f32 %v815_v3, %v814_v2 }
 0x22c   : > { %v817_v5 = vrot.slane %v816_v4, 2 }
 0x22e   : > { %v818_v6 = vadd.f32 %v817_v5, %v816_v4 }
 0x230   : > { %v819_v7 = vrot.slane %v818_v6, 1 }
 0x232   : > { %v820_v8 = vadd.f32 %v819_v7, %v818_v6 }
 0x234   : > { %1077 = vpush %v820_v8 }
 0x265   : > { %s1078_s7 = spop %1077  ;;  %829 = sbr.rel (%p1034_p5) target bundleno = 693 (0x2b5), region = 60 }
 0x266   : > { %v822_v13 = vstv %s1078_s7 }
 0x267   : > { %v823_v14 = vadd.f32 %v822_v13, %v769_v12 }
 0x269   : > { %824 = vst.msk [vmem:[#allocation4] sm:$0x1] %vm593_vm3, %v823_v14 }
 0x26a   : > { %v830_v16 = vld [vmem:[#allocation2] sm:$0x1]  ;;  %v833_v19 = vld [vmem:[#allocation3] sm:$0x1] }
 0x26b   : > { %v831_v17 = vmul.f32 0.0078125, %v830_v16 }
 0x26d   : > { %v832_v20 = vadd.f32 %v831_v17, %v1313_v57 }
 0x270   : > { %v834_v15 = vld [vmem:[#allocation4] sm:$0x1] }
 0x271   : > { %1118 = vlog2.f32 %v834_v15 }
 0x277   : > { %v1119_v18 = vpop.eup %1118 }
 0x278   : > { %v836_v21 = vmul.f32 0.6931472, %v1119_v18 }
 0x27a   : > { %v837_v22 = vadd.f32 %v836_v21, %v833_v19 }
 0x27c   : > { %v838_v23 = vsub.f32 %v832_v20, %v837_v22 }
 0x27e   : > { %v839_v24 = vadd.f32 4.8520303, %v838_v23 }
 0x280   : > { %1079 = vpush %v839_v24 }
 0x2b1   : > { %s1080_s10 = spop %1079 }
 0x2b2   : > { %s841_s11 = ssub.f32 0.0, %s1080_s10 }
 0x2b4   : > { %843 = sst [smem:[#allocation6]] %s841_s11 }
 0x2b5 PF: > { %p1085_p6 = scmp.eq.s32.totalorder %s1203_s30, 1  ;;  %s850_s16 = sshll.u32 %s1355_s8, 4  ;;  %s851_s16 = int_to_ptr.hbm [resolvable:$true] %s850_s16 }
 0x2b6   : > { %s1148_s17 = smov [#allocation6]  }
 0x2b7   : > { %1082 = dma.smem_to_hbm (%p1085_p6), %s1148_s17, 16, %s851_s16, [#allocation7]  }
 0x2b8   : > { %1139 = dma.done.wait (%p1085_p6), [#allocation7], 16  }
 0x2b9   : > { %1141 = vsyncadd (%p1085_p6), [#allocation7], 4294967280 }
 0x2ba   : > { %859 = sfence }
 0x2bb PF: > { %s20_s29 = sadd.s32 1, %s1144_s29  }
 0x2bc   : > { %p17_p7 = scmp.ge.s32.totalorder %s20_s29, 4  }
 0x2be   :  { %19 = sbr.rel (!%p17_p7) target bundleno = 3 (0x3), region = 94 }
 0x2c3   :  { %865 = vsyncpa [#allocation7], 1 }
 0x2c4   :  { %867 = vsyncpa [#allocation7 + $0x1], 1 }

</bundles_post_ra>
